<compile_context>
chip_gen: v7x
topology: tpu7x:2x2x1
jax: 0.10.0
libtpu: 0.0.40
codegen_flags: <defaults>
</compile_context>

<pallas_src>
import functools

import jax
import jax.numpy as jnp
from jax.experimental import pallas as pl
from jax.experimental.pallas import tpu as pltpu

WEIGHT_CE = 0.5
WEIGHT_DICE = 0.5
SMOOTH = 1e-7


def _combined_loss_kernel(x_ref, t_ref, out_ref, acc_ref, *, hw, tile_hw, needs_mask):
    j = pl.program_id(1)  # pixel-tile index (reduction axis)

    # Per-batch-block init (NOT gated on the batch axis -> correct under megacore
    # sharding of the 'parallel' batch axis).
    @pl.when(j == 0)
    def _():
        acc_ref[...] = jnp.zeros_like(acc_ref)

    x = x_ref[...].astype(jnp.float32)   # (bn, C, tile_hw) logits
    t = t_ref[...].astype(jnp.float32)   # (bn, C, tile_hw) soft targets

    if needs_mask:
        # Zero lanes past the true H*W extent of a ragged last tile.  Keep this a
        # select (not a multiply): OOB lanes may hold arbitrary garbage/NaNs.
        lane = jax.lax.broadcasted_iota(jnp.int32, (1, 1, tile_hw), 2)
        valid = (j * tile_hw + lane) < hw
        x = jnp.where(valid, x, 0.0)
        t = jnp.where(valid, t, 0.0)

    C = x.shape[1]
    ch = jax.lax.broadcasted_iota(jnp.int32, x.shape, 1)

    # First-occurrence argmax over channels (matches torch.argmax); the channel
    # max is reused by the log-softmax below.
    m = jnp.max(x, axis=1, keepdims=True)                               # (bn, 1, T)
    a_out = jnp.min(jnp.where(x == m, ch, C), axis=1,
                    keepdims=True).astype(jnp.float32)
    t_max = jnp.max(t, axis=1, keepdims=True)
    a_tgt = jnp.min(jnp.where(t == t_max, ch, C), axis=1,
                    keepdims=True).astype(jnp.float32)

    # Soft-target CE per pixel without materializing log_softmax:
    #   -sum_c t_c * (z_c - lse) = lse * sum_c(t) - sum_c(t * z)
    # Keeping the explicit sum_c(t) term makes masked lanes contribute exactly 0
    # and keeps parity with the PyTorch reference for non-normalized targets.
    z = x - m
    lse = jnp.log(jnp.sum(jnp.exp(z), axis=1, keepdims=True))           # (bn, 1, T)
    t_sum = jnp.sum(t, axis=1, keepdims=True)
    t_dot_z = jnp.sum(t * z, axis=1, keepdims=True)
    ce_px = lse * t_sum - t_dot_z                                       # (bn, 1, T)

    # Pack the four per-pixel partials onto sublanes of one accumulator so the
    # per-step read-modify-write is a single vld/vadd/vst stream.
    stacked = jnp.concatenate([ce_px, a_out * a_tgt, a_out, a_tgt], axis=1)
    acc_ref[...] += stacked                                             # (bn, 4, T)

    # Per-batch-block epilogue: write lane-dense partial sums for this block.
    @pl.when(j == pl.num_programs(1) - 1)
    def _():
        s = jnp.sum(acc_ref[...], axis=2, keepdims=True)                # (bn, 4, 1)
        s = jnp.sum(s, axis=0)                                          # (4, 1)
        out_ref[...] = jnp.broadcast_to(s, out_ref.shape)               # (4, 128)


def _sublane_pad(c, itemsize):
    mult = 8 * max(1, 4 // max(1, itemsize))   # f32 -> 8, bf16 -> 16, int8 -> 32
    return -(-c // mult) * mult


def _vmem_limit_bytes():
    try:
        cap = int(pltpu.get_tpu_info().vmem_capacity_bytes)
    except Exception:
        cap = 64 << 20  # conservative fallback (v7x per-core VMEM)
    return max(16 << 20, int(cap * 0.75))


def _pick_tiling(N, C, HW, in_itemsizes, vmem_limit_bytes):
    """Choose (bn, tile_hw, n_tiles, needs_mask) under a padded-VMEM budget."""
    budget = int(vmem_limit_bytes * 0.75)       # headroom for compiler internals
    c_pad_f32 = _sublane_pad(C, 4)
    n_temps = 10  # conservative allowance for live f32 (C_pad, lanes) temporaries
    bytes_per_lane = (
        sum(2 * _sublane_pad(C, it) * it for it in in_itemsizes)  # 2x-buffered inputs
        + 8 * 4                                                   # fused (4->8, T) f32 accumulator
        + n_temps * c_pad_f32 * 4)                                # compute temporaries
    max_lanes = max(128, budget // bytes_per_lane)

    if HW >= max_lanes:
        # Large feature maps: one batch item per step, tile the pixel axis.
        bn = 1
        tile_hw = (max_lanes // 128) * 128
        n_tiles = pl.cdiv(HW, tile_hw)
        needs_mask = (HW % tile_hw) != 0
    else:
        # Small feature maps: whole pixel axis per step, block several batch items.
        tile_hw = HW
        n_tiles = 1
        needs_mask = False
        lanes_per_item = max(128, -(-HW // 128) * 128)
        bn = max(1, min(N, max_lanes // lanes_per_item))
        while N % bn != 0:   # keep the batch grid exact (no ragged batch blocks)
            bn -= 1
    return bn, tile_hw, n_tiles, needs_mask


def combined_loss(outputs, targets, *, _force_tiling=None):
    """outputs, targets: (N, C, H, W) float arrays (NCHW, like PyTorch).

    bf16 inputs are also accepted (the kernel upcasts to f32 internally), which
    halves HBM traffic for this bandwidth-bound reduction.
    """
    N, C, H, W = outputs.shape
    assert targets.shape == outputs.shape
    HW = H * W

    # Free reshape (no transpose / extra HBM pass): channels stay on the sublane
    # axis, pixels on the lane axis.
    x = outputs.reshape(N, C, HW)
    t = targets.reshape(N, C, HW)

    vmem_limit = _vmem_limit_bytes()
    if _force_tiling is not None:          # test hook: exercise masked multi-tile path
        bn, tile_hw = _force_tiling
        n_tiles = pl.cdiv(HW, tile_hw)
        needs_mask = (HW % tile_hw) != 0
    else:
        itemsizes = (jnp.dtype(outputs.dtype).itemsize,
                     jnp.dtype(targets.dtype).itemsize)
        bn, tile_hw, n_tiles, needs_mask = _pick_tiling(N, C, HW, itemsizes, vmem_limit)
    nb = N // bn

    kernel = functools.partial(
        _combined_loss_kernel, hw=HW, tile_hw=tile_hw, needs_mask=needs_mask)

    partials = pl.pallas_call(
        kernel,
        out_shape=jax.ShapeDtypeStruct((nb, 4, 128), jnp.float32),
        grid=(nb, n_tiles),
        in_specs=[
            pl.BlockSpec((bn, C, tile_hw), lambda n, j: (n, 0, j)),
            pl.BlockSpec((bn, C, tile_hw), lambda n, j: (n, 0, j)),
        ],
        # Lane-dense per-batch-block partial sums; the block index depends only
        # on the batch axis, so it acts as an accumulator along the pixel axis.
        out_specs=pl.BlockSpec((None, 4, 128), lambda n, j: (n, 0, 0)),
        scratch_shapes=[pltpu.VMEM((bn, 4, tile_hw), jnp.float32)],
        compiler_params=pltpu.CompilerParams(
            # Batch axis 'parallel' (safe: per-batch-block init/epilogue + partial
            # outputs); pixel reduction axis stays 'arbitrary'.
            dimension_semantics=("parallel", "arbitrary"),
            vmem_limit_bytes=vmem_limit,
        ),
    )(x, t)

    # Tiny final combine in XLA: partials rows are [ce_sum, inter, sum_aout, sum_atgt].
    tot = jnp.sum(partials[:, :, 0], axis=0)
    ce_mean = tot[0] / jnp.float32(N * HW)
    dice_coeff = (2.0 * tot[1] + SMOOTH) / (tot[2] + tot[3] + SMOOTH)
    return WEIGHT_CE * ce_mean + WEIGHT_DICE * (1.0 - dice_coeff)


def _reference(outputs, targets):
    # pure-JAX reference mirroring the PyTorch module
    log_sm = jax.nn.log_softmax(outputs, axis=1)
    ce = -jnp.mean(jnp.sum(targets * log_sm, axis=1))
    a_out = jnp.argmax(outputs, axis=1).astype(jnp.float32).reshape(-1)
    a_tgt = jnp.argmax(targets, axis=1).astype(jnp.float32).reshape(-1)
    inter = jnp.sum(a_out * a_tgt)
    dice = (2.0 * inter + SMOOTH) / (jnp.sum(a_out) + jnp.sum(a_tgt) + SMOOTH)
    return WEIGHT_CE * ce + WEIGHT_DICE * (1.0 - dice)


if __name__ == "__main__":
    key = jax.random.PRNGKey(0)
    k1, k2, k3, k4 = jax.random.split(key, 4)

    # 1) Default tiling path (tiny feature map -> whole problem in one grid step,
    #    batch items blocked together on the lane axis).
    N, C, H, W = 2, 4, 16, 16
    outputs = jax.random.normal(k1, (N, C, H, W), dtype=jnp.float32)
    targets = jax.nn.softmax(
        jax.random.normal(k2, (N, C, H, W), dtype=jnp.float32), axis=1)
    got = jax.block_until_ready(combined_loss(outputs, targets))
    want = jax.block_until_ready(_reference(outputs, targets))
    assert jnp.allclose(got, want, rtol=1e-5, atol=1e-5), (got, want)

    # 2) Forced multi-tile path: exercises the cross-tile accumulator and the
    #    ragged-lane mask (H*W = 300 split into 128-lane tiles, last tile ragged).
    H2, W2 = 12, 25
    outputs2 = jax.random.normal(k3, (N, C, H2, W2), dtype=jnp.float32)
    targets2 = jax.nn.softmax(
        jax.random.normal(k4, (N, C, H2, W2), dtype=jnp.float32), axis=1)
    got2 = jax.block_until_ready(
        combined_loss(outputs2, targets2, _force_tiling=(1, 128)))
    want2 = jax.block_until_ready(_reference(outputs2, targets2))
    assert jnp.allclose(got2, want2, rtol=1e-5, atol=1e-5), (got2, want2)

    print("KERNEL_OK")
</pallas_src>

<mosaic_0001>
module attributes {stable_mosaic.version = 11 : i64} {
  func.func @_combined_loss_kernel(%arg0: i32, %arg1: i32, %arg2: memref<2x4x256xf32, #tpu.memory_space<vmem>>, %arg3: memref<2x4x256xf32, #tpu.memory_space<vmem>>, %arg4: memref<1x4x128xf32, #tpu.memory_space<vmem>>, %arg5: memref<2x4x256xf32, #tpu.memory_space<vmem>>) attributes {dimension_semantics = [#tpu.dimension_semantics<parallel>, #tpu.dimension_semantics<arbitrary>], iteration_bounds = array<i64: 1, 1>, scalar_prefetch = 0 : i64, scratch_operands = 1 : i64, tpu.core_type = #tpu.core_type<tc>, window_params = [{transform_indices = @transform_0, window_bounds = array<i64: 2, 4, 256>}, {transform_indices = @transform_1, window_bounds = array<i64: 2, 4, 256>}, {transform_indices = @transform_2, window_bounds = array<i64: 1, 4, 128>}]} {
    %c0_i32 = arith.constant 0 : i32
    %0 = arith.cmpi eq, %arg1, %c0_i32 : i32
    %1 = arith.extui %0 : i1 to i32
    %c0_i32_0 = arith.constant 0 : i32
    %2 = arith.cmpi ne, %1, %c0_i32_0 : i32
    scf.if %2 {
      %cst_21 = arith.constant 0.000000e+00 : f32
      %45 = vector.broadcast %cst_21 : f32 to vector<2x4x256xf32>
      %c0_22 = arith.constant 0 : index
      %c0_23 = arith.constant 0 : index
      %c0_24 = arith.constant 0 : index
      %46 = vector.load %arg5[%c0_22, %c0_23, %c0_24] : memref<2x4x256xf32, #tpu.memory_space<vmem>>, vector<2x4x256xf32>
      tpu.vector_store %arg5[%c0_22, %c0_23, %c0_24], %45 {strides = array<i32>} : memref<2x4x256xf32, #tpu.memory_space<vmem>>, vector<2x4x256xf32>,
    } else {
    }
    %c0 = arith.constant 0 : index
    %c0_1 = arith.constant 0 : index
    %c0_2 = arith.constant 0 : index
    %3 = vector.load %arg2[%c0, %c0_1, %c0_2] : memref<2x4x256xf32, #tpu.memory_space<vmem>>, vector<2x4x256xf32>
    %c0_3 = arith.constant 0 : index
    %c0_4 = arith.constant 0 : index
    %c0_5 = arith.constant 0 : index
    %4 = vector.load %arg3[%c0_3, %c0_4, %c0_5] : memref<2x4x256xf32, #tpu.memory_space<vmem>>, vector<2x4x256xf32>
    %5 = tpu.iota {dimensions = array<i32: 1>} : vector<2x4x256xi32>
    %cst = arith.constant dense<0xFF800000> : vector<2x256xf32>
    %6 = vector.multi_reduction <maximumf>, %3, %cst [1] : vector<2x4x256xf32> to vector<2x256xf32>
    %7 = vector.shape_cast %6 : vector<2x256xf32> to vector<2x1x256xf32>
    %8 = vector.broadcast %7 : vector<2x1x256xf32> to vector<2x4x256xf32>
    %9 = arith.cmpf oeq, %3, %8 : vector<2x4x256xf32>
    %c4_i32 = arith.constant 4 : i32
    %10 = vector.broadcast %c4_i32 : i32 to vector<2x4x256xi32>
    %11 = arith.select %9, %5, %10 : vector<2x4x256xi1>, vector<2x4x256xi32>
    %cst_6 = arith.constant dense<2147483647> : vector<2x256xi32>
    %12 = vector.multi_reduction <minsi>, %11, %cst_6 [1] : vector<2x4x256xi32> to vector<2x256xi32>
    %13 = vector.shape_cast %12 : vector<2x256xi32> to vector<2x1x256xi32>
    %14 = arith.sitofp %13 : vector<2x1x256xi32> to vector<2x1x256xf32>
    %cst_7 = arith.constant dense<0xFF800000> : vector<2x256xf32>
    %15 = vector.multi_reduction <maximumf>, %4, %cst_7 [1] : vector<2x4x256xf32> to vector<2x256xf32>
    %16 = vector.shape_cast %15 : vector<2x256xf32> to vector<2x1x256xf32>
    %17 = vector.broadcast %16 : vector<2x1x256xf32> to vector<2x4x256xf32>
    %18 = arith.cmpf oeq, %4, %17 : vector<2x4x256xf32>
    %c4_i32_8 = arith.constant 4 : i32
    %19 = vector.broadcast %c4_i32_8 : i32 to vector<2x4x256xi32>
    %20 = arith.select %18, %5, %19 : vector<2x4x256xi1>, vector<2x4x256xi32>
    %cst_9 = arith.constant dense<2147483647> : vector<2x256xi32>
    %21 = vector.multi_reduction <minsi>, %20, %cst_9 [1] : vector<2x4x256xi32> to vector<2x256xi32>
    %22 = vector.shape_cast %21 : vector<2x256xi32> to vector<2x1x256xi32>
    %23 = arith.sitofp %22 : vector<2x1x256xi32> to vector<2x1x256xf32>
    %24 = vector.broadcast %7 : vector<2x1x256xf32> to vector<2x4x256xf32>
    %25 = arith.subf %3, %24 : vector<2x4x256xf32>
    %26 = math.exp %25 : vector<2x4x256xf32>
    %cst_10 = arith.constant dense<0.000000e+00> : vector<2x256xf32>
    %27 = vector.multi_reduction <add>, %26, %cst_10 [1] : vector<2x4x256xf32> to vector<2x256xf32>
    %28 = vector.shape_cast %27 : vector<2x256xf32> to vector<2x1x256xf32>
    %29 = math.log %28 : vector<2x1x256xf32>
    %cst_11 = arith.constant dense<0.000000e+00> : vector<2x256xf32>
    %30 = vector.multi_reduction <add>, %4, %cst_11 [1] : vector<2x4x256xf32> to vector<2x256xf32>
    %31 = vector.shape_cast %30 : vector<2x256xf32> to vector<2x1x256xf32>
    %32 = arith.mulf %4, %25 : vector<2x4x256xf32>
    %cst_12 = arith.constant dense<0.000000e+00> : vector<2x256xf32>
    %33 = vector.multi_reduction <add>, %32, %cst_12 [1] : vector<2x4x256xf32> to vector<2x256xf32>
    %34 = vector.shape_cast %33 : vector<2x256xf32> to vector<2x1x256xf32>
    %35 = arith.mulf %29, %31 : vector<2x1x256xf32>
    %36 = arith.subf %35, %34 : vector<2x1x256xf32>
    %37 = arith.mulf %14, %23 : vector<2x1x256xf32>
    %38 = tpu.concatenate %36, %37, %14, %23 in 1 : vector<2x1x256xf32>, vector<2x1x256xf32>, vector<2x1x256xf32>, vector<2x1x256xf32> -> vector<2x4x256xf32>
    %c0_13 = arith.constant 0 : index
    %c0_14 = arith.constant 0 : index
    %c0_15 = arith.constant 0 : index
    %39 = vector.load %arg5[%c0_13, %c0_14, %c0_15] : memref<2x4x256xf32, #tpu.memory_space<vmem>>, vector<2x4x256xf32>
    %40 = arith.addf %39, %38 : vector<2x4x256xf32>
    %c0_16 = arith.constant 0 : index
    %c0_17 = arith.constant 0 : index
    %c0_18 = arith.constant 0 : index
    %41 = vector.load %arg5[%c0_16, %c0_17, %c0_18] : memref<2x4x256xf32, #tpu.memory_space<vmem>>, vector<2x4x256xf32>
    tpu.vector_store %arg5[%c0_16, %c0_17, %c0_18], %40 {strides = array<i32>} : memref<2x4x256xf32, #tpu.memory_space<vmem>>, vector<2x4x256xf32>,
    %c0_i32_19 = arith.constant 0 : i32
    %42 = arith.cmpi eq, %arg1, %c0_i32_19 : i32
    %43 = arith.extui %42 : i1 to i32
    %c0_i32_20 = arith.constant 0 : i32
    %44 = arith.cmpi ne, %43, %c0_i32_20 : i32
    scf.if %44 {
      %c0_21 = arith.constant 0 : index
      %c0_22 = arith.constant 0 : index
      %c0_23 = arith.constant 0 : index
      %45 = vector.load %arg5[%c0_21, %c0_22, %c0_23] : memref<2x4x256xf32, #tpu.memory_space<vmem>>, vector<2x4x256xf32>
      %cst_24 = arith.constant dense<0.000000e+00> : vector<2x4xf32>
      %46 = vector.multi_reduction <add>, %45, %cst_24 [2] : vector<2x4x256xf32> to vector<2x4xf32>
      %47 = vector.shape_cast %46 : vector<2x4xf32> to vector<2x4x1xf32>
      %cst_25 = arith.constant dense<0.000000e+00> : vector<4x1xf32>
      %48 = vector.multi_reduction <add>, %47, %cst_25 [0] : vector<2x4x1xf32> to vector<4x1xf32>
      %49 = vector.shape_cast %48 : vector<4x1xf32> to vector<4x1xf32>
      %50 = vector.broadcast %49 : vector<4x1xf32> to vector<4x128xf32>
      %c0_26 = arith.constant 0 : index
      %c0_27 = arith.constant 0 : index
      %c0_28 = arith.constant 0 : index
      %51 = vector.load %arg4[%c0_26, %c0_27, %c0_28] : memref<1x4x128xf32, #tpu.memory_space<vmem>>, vector<1x4x128xf32>
      %52 = vector.shape_cast %51 : vector<1x4x128xf32> to vector<4x128xf32>
      %53 = vector.shape_cast %50 : vector<4x128xf32> to vector<1x4x128xf32>
      tpu.vector_store %arg4[%c0_26, %c0_27, %c0_28], %53 {strides = array<i32>} : memref<1x4x128xf32, #tpu.memory_space<vmem>>, vector<1x4x128xf32>,
    } else {
    }
    return
  }
  func.func @transform_0(%arg0: i32, %arg1: i32) -> (i32, i32, i32) {
    %c0_i32 = arith.constant 0 : i32
    %c0_i32_0 = arith.constant 0 : i32
    return %arg0, %c0_i32, %arg1 : i32, i32, i32
  }
  func.func @transform_1(%arg0: i32, %arg1: i32) -> (i32, i32, i32) {
    %c0_i32 = arith.constant 0 : i32
    %c0_i32_0 = arith.constant 0 : i32
    return %arg0, %c0_i32, %arg1 : i32, i32, i32
  }
  func.func @transform_2(%arg0: i32, %arg1: i32) -> (i32, i32, i32) {
    %c0_i32 = arith.constant 0 : i32
    %c0_i32_0 = arith.constant 0 : i32
    %c0_i32_1 = arith.constant 0 : i32
    return %arg0, %c0_i32, %c0_i32_0 : i32, i32, i32
  }
}

</mosaic_0001>

<bundles_post_ra>
// kernel: tpu_custom_call.1
= control target key start
LH: loop header
LB: loop body
LE: loop exit
PB: predicated region body
PF: predicated region fallthrough
CT: control target
= control target key end

     0   :  { %7 = vsyncpa [#allocation4], 0  ;;  %s746_s0 = inlined_call_operand.hbm [shape: f32[2,4,256], index: 0, kind: input, shape index: {}]   ;;  %s747_s1 = inlined_call_operand.hbm [shape: f32[2,4,256], index: 1, kind: input, shape index: {}]   ;;  %s748_s2 = inlined_call_operand.hbm [shape: f32[1,4,128], index: 2, kind: output, shape index: {}]  }
   0x1   :  { %8 = vsyncpa [#allocation7], 0 }
   0x2   :  { %9 = vsyncpa [#allocation5], 0  ;;  %s534_s9 = smov [#allocation3]   ;;  %s462_s13 = scalar_lea.hbm %s746_s0, 256 }
   0x3   :  { %s15_s10 = sshll.u32 %s534_s9, 4  ;;  %p463_p0 = scmp.ne.s32.totalorder %s746_s0, %s462_s13  ;;  %s16_s10 = int_to_ptr.vmem [resolvable:$true] %s15_s10 }
   0x4   :  { %p466_p1 = scmp.lt.u32.totalorder %s462_s13, %s746_s0 }
   0x6   :  { %p468_p2 = pnand %p466_p1, %p463_p0 }
   0x8   :  { %471 = shalt.err (!%p468_p2)
}
   0x9   :  { %s472_s18 = scalar_lea.vmem %s16_s10, 256  ;;  %p477_p4 = scmp.lt.s32.totalorder %s16_s10, %s16_s10 }
   0xa   :  { %p473_p3 = scmp.ne.s32.totalorder %s16_s10, %s472_s18  ;;  %p478_p5 = scmp.lt.s32.totalorder %s472_s18, %s472_s18 }
   0xc   :  { %p479_p6 = por %p478_p5, %p477_p4 }
   0xe   :  { %p480_p7 = pnand %p479_p6, %p473_p3 }
  0x10   :  { %483 = shalt.err (!%p480_p7)
}
  0x11   :  { %s535_s19 = smov 128   ;;  %s536_s20 = smov 8  }
  0x12   :  { %21 = dma.hbm_to_vmem [thread:$0]  %s746_s0, 256, %s16_s10, [#allocation4], %s535_s19, %s535_s19, %s536_s20  }
  0x13   :  { %s537_s23 = smov [#allocation6]   ;;  %s484_s27 = scalar_lea.hbm %s747_s1, 256 }
  0x14   :  { %s27_s24 = sshll.u32 %s537_s23, 4  ;;  %p485_p8 = scmp.ne.s32.totalorder %s747_s1, %s484_s27  ;;  %s28_s24 = int_to_ptr.vmem [resolvable:$true] %s27_s24 }
  0x15   :  { %p488_p9 = scmp.lt.u32.totalorder %s484_s27, %s747_s1 }
  0x17   :  { %p490_p10 = pnand %p488_p9, %p485_p8 }
  0x19   :  { %493 = shalt.err (!%p490_p10)
}
  0x1a   :  { %s494_s4 = scalar_lea.vmem %s28_s24, 256  ;;  %p499_p12 = scmp.lt.s32.totalorder %s28_s24, %s28_s24 }
  0x1b   :  { %p495_p11 = scmp.ne.s32.totalorder %s28_s24, %s494_s4  ;;  %p500_p13 = scmp.lt.s32.totalorder %s494_s4, %s494_s4 }
  0x1d   :  { %p501_p0 = por %p500_p13, %p499_p12 }
  0x1f   :  { %p502_p1 = pnand %p501_p0, %p495_p11 }
  0x21   :  { %505 = shalt.err (!%p502_p1)
}
  0x22   :  { %33 = dma.hbm_to_vmem [thread:$0]  %s747_s1, 256, %s28_s24, [#allocation7], %s535_s19, %s535_s19, %s536_s20  }
  0x23   :  { %528 = dma.done.wait [#allocation4], 256  }
  0x24   :  { %529 = vsyncadd [#allocation4], 4294967040 }
  0x25   :  { %530 = dma.done.wait [#allocation7], 256  }
  0x26   :  { %531 = vsyncadd [#allocation7], 4294967040  ;;  %vm58_vm0 = vcmask 1043456   ;;  %v579_v0 = vld [vmem:[#allocation3] sm:$0xff]  ;;  %v581_v1 = vld [vmem:[#allocation6] sm:$0xff]  ;;  %v50_v2 = vlaneseq  ;;  %s539_s1 = smov [#allocation8]  }
  0x27   :  { %v583_v3 = vld [vmem:[#allocation3 + $0x8] sm:$0xff]  ;;  %v54_v4 = vcombine.high %v579_v0, %v579_v0  ;;  %v59_v5 = vsel %vm58_vm0, %v579_v0, -inf  ;;  %v154_v6 = vcombine.high %v581_v1, %v581_v1  ;;  %v158_v7 = vsel %vm58_vm0, %v581_v1, -inf  ;;  %v608_v60 = vld [vmem:[#allocation6 + $0x8] sm:$0xff]  ;;  %s428_s6 = sshll.u32 %s539_s1, 4  ;;  %s429_s6 = int_to_ptr.vmem [resolvable:$true] %s428_s6 }
  0x28   :  { %v60_v8 = vrot.slane %v59_v5, 4  ;;  %v159_v9 = vrot.slane %v158_v7, 4  ;;  %v55_v10 = vcombine.high %v583_v3, %v583_v3  ;;  %v538_v12 = vmov 839922192   ;;  %s506_s7 = scalar_lea.vmem %s429_s6, 64  ;;  %p511_p3 = scmp.lt.s32.totalorder %s429_s6, %s429_s6 }
  0x29   :  { %v66_v11 = vsel %vm58_vm0, %v54_v4, -inf  ;;  %v98_v13 = vunpack.c.l.s4 %v538_v12  ;;  %v165_v14 = vsel %vm58_vm0, %v154_v6, -inf  ;;  %v51_v19 = vshrl.u32 %v50_v2, 7  ;;  %p507_p2 = scmp.ne.s32.totalorder %s429_s6, %s506_s7  ;;  %p512_p4 = scmp.lt.s32.totalorder %s506_s7, %s506_s7 }
  0x2a   :  { %v61_v15 = vmax.f32 %v59_v5, %v60_v8  ;;  %v67_v16 = vrot.slane %v66_v11, 4  ;;  %v160_v17 = vmax.f32 %v158_v7, %v159_v9  ;;  %v166_v18 = vrot.slane %v165_v14, 4 }
  0x2b   :  { %v292_v20 = vsel %vm58_vm0, %v581_v1, 0.0  ;;  %v73_v21 = vsel %vm58_vm0, %v583_v3, -inf  ;;  %v80_v22 = vsel %vm58_vm0, %v55_v10, -inf  ;;  %v99_v27 = vunpack.c.0.s8 %v98_v13  ;;  %p513_p5 = por %p512_p4, %p511_p3 }
  0x2c   :  { %v62_v23 = vrot.slane %v61_v15, 2  ;;  %v68_v24 = vmax.f32 %v66_v11, %v67_v16  ;;  %v161_v25 = vrot.slane %v160_v17, 2  ;;  %v167_v26 = vmax.f32 %v165_v14, %v166_v18 }
  0x2d   :  { %v299_v28 = vsel %vm58_vm0, %v154_v6, 0.0  ;;  %v74_v29 = vrot.slane %v73_v21, 4  ;;  %v81_v30 = vrot.slane %v80_v22, 4  ;;  %v293_v35 = vrot.slane %v292_v20, 4  ;;  %p514_p6 = pnand %p513_p5, %p507_p2 }
  0x2e   :  { %v63_v31 = vmax.f32 %v61_v15, %v62_v23  ;;  %v69_v32 = vrot.slane %v68_v24, 2  ;;  %v162_v33 = vmax.f32 %v160_v17, %v161_v25  ;;  %v168_v34 = vrot.slane %v167_v26, 2 }
  0x2f   :  { %v75_v36 = vmax.f32 %v73_v21, %v74_v29  ;;  %v82_v37 = vmax.f32 %v80_v22, %v81_v30  ;;  %v102_v42 = vsub.s32 %v99_v27, %v51_v19  ;;  %v300_v43 = vrot.slane %v299_v28, 4 }
  0x30   :  { %v64_v38 = vrot.slane %v63_v31, 1  ;;  %v70_v39 = vmax.f32 %v68_v24, %v69_v32  ;;  %v163_v40 = vrot.slane %v162_v33, 1  ;;  %v169_v41 = vmax.f32 %v167_v26, %v168_v34 }
  0x31   :  { %v294_v48 = vadd.f32 %v293_v35, %v292_v20  ;;  %v76_v49 = vrot.slane %v75_v36, 2  ;;  %v83_v52 = vrot.slane %v82_v37, 2  ;;  %v603_v53 = vrot.slane %v51_v19, %v102_v42 }
  0x32   :  { %v65_v44 = vmax.f32 %v63_v31, %v64_v38  ;;  %v71_v45 = vrot.slane %v70_v39, 1  ;;  %v164_v46 = vmax.f32 %v162_v33, %v163_v40  ;;  %v170_v47 = vrot.slane %v169_v41, 1 }
  0x33   :  { %v301_v54 = vadd.f32 %v300_v43, %v299_v28  ;;  %v295_v57 = vrot.slane %v294_v48, 2  ;;  %v77_v58 = vmax.f32 %v75_v36, %v76_v49  ;;  %v84_v61 = vmax.f32 %v82_v37, %v83_v52 }
  0x34   :  { %v72_v50 = vmax.f32 %v70_v39, %v71_v45  ;;  %v171_v51 = vmax.f32 %v169_v41, %v170_v47  ;;  %v172_v4 = vsel %vm58_vm0, %v608_v60, -inf }
  0x35   :  { %v302_v2 = vrot.slane %v301_v54, 2  ;;  %v78_v11 = vrot.slane %v77_v58, 1  ;;  %v85_v15 = vrot.slane %v84_v61, 1  ;;  %v173_v20 = vrot.slane %v172_v4, 4 }
  0x36   :  { %v91_v55 = vcombine.low %v65_v44, %v72_v50  ;;  %v190_v56 = vcombine.low %v164_v46, %v171_v51  ;;  %v623_v32 = vadd.f32 %v295_v57, %v294_v48  ;;  %v637_v51 = vsel %vm58_vm0, %v608_v60, 0.0 }
  0x37   :  { %v79_v27 = vmax.f32 %v77_v58, %v78_v11  ;;  %v86_v28 = vmax.f32 %v84_v61, %v85_v15  ;;  %v174_v29 = vmax.f32 %v172_v4, %v173_v20  ;;  %v625_v33 = vadd.f32 %v302_v2, %v301_v54 }
  0x38   :  { %vm95_vm1 = vcmp.eq.f32.partialorder %v579_v0, %v91_v55  ;;  %vm194_vm2 = vcmp.eq.f32.partialorder %v581_v1, %v190_v56  ;;  %v244_v59 = vsub.f32 %v579_v0, %v91_v55  ;;  %v297_v41 = vrot.slane %v623_v32, 1 }
  0x39   :  { %v104_v62 = vsel %vm95_vm1, %v603_v53, 4  ;;  %v196_v63 = vsel %vm194_vm2, %v603_v53, 4  ;;  %v92_v38 = vcombine.low %v79_v27, %v86_v28  ;;  %v175_v39 = vrot.slane %v174_v29, 2 }
  0x3a   :  { %v106_v5 = vcombine.high %v104_v62, %v104_v62  ;;  %v108_v6 = vsel %vm58_vm0, %v104_v62, 2147483647  ;;  %v198_v7 = vcombine.high %v196_v63, %v196_v63  ;;  %v200_v8 = vsel %vm58_vm0, %v196_v63, 2147483647 }
  0x3b   :  { %v109_v9 = vrot.slane %v108_v6, 4  ;;  %v201_v10 = vrot.slane %v200_v8, 4  ;;  %v246_v0 = vmul.f32 1.442695, %v244_v59  ;;  %v320_v14 = vmul.f32 %v244_v59, %v581_v1 }
  0x3c   :  { %v118_v12 = vsel %vm58_vm0, %v106_v5, 2147483647  ;;  %v210_v13 = vsel %vm58_vm0, %v198_v7, 2147483647  ;;  %v621_v1 = vcombine.high %v608_v60, %v608_v60  ;;  %v304_v42 = vrot.slane %v625_v33, 1 }
  0x3d   :  { %vm110_vm3 = vcmp.lt.s32.totalorder %v108_v6, %v109_v9  ;;  %v119_v16 = vrot.slane %v118_v12, 4  ;;  %vm202_vm4 = vcmp.lt.s32.totalorder %v200_v8, %v201_v10  ;;  %v211_v17 = vrot.slane %v210_v13, 4 }
  0x3e   :  { %v111_v18 = vsel %vm110_vm3, %v108_v6, %v109_v9  ;;  %v203_v19 = vsel %vm202_vm4, %v200_v8, %v201_v10  ;;  %450 = vpow2.f32 %v246_v0  ;;  %v324_v26 = vcombine.high %v320_v14, %v320_v14 }
  0x3f   :  { %v112_v21 = vrot.slane %v111_v18, 2  ;;  %vm120_vm5 = vcmp.lt.s32.totalorder %v118_v12, %v119_v16  ;;  %v204_v22 = vrot.slane %v203_v19, 2  ;;  %vm212_vm6 = vcmp.lt.s32.totalorder %v210_v13, %v211_v17 }
  0x40   :  { %v121_v23 = vsel %vm120_vm5, %v118_v12, %v119_v16  ;;  %v213_v24 = vsel %vm212_vm6, %v210_v13, %v211_v17  ;;  %v328_v34 = vsel %vm58_vm0, %v320_v14, 0.0  ;;  %v335_v36 = vsel %vm58_vm0, %v324_v26, 0.0 }
  0x41   :  { %vm113_vm7 = vcmp.lt.s32.totalorder %v111_v18, %v112_v21  ;;  %v122_v25 = vrot.slane %v121_v23, 2  ;;  %vm205_vm8 = vcmp.lt.s32.totalorder %v203_v19, %v204_v22  ;;  %v214_v31 = vrot.slane %v213_v24, 2 }
  0x42   :  { %v114_v30 = vsel %vm113_vm7, %v111_v18, %v112_v21  ;;  %v206_v35 = vsel %vm205_vm8, %v203_v19, %v204_v22  ;;  %v179_v40 = vsel %vm58_vm0, %v621_v1, -inf  ;;  %v329_v43 = vrot.slane %v328_v34, 4 }
  0x43   :  { %vm123_vm9 = vcmp.lt.s32.totalorder %v121_v23, %v122_v25  ;;  %v115_v37 = vrot.slane %v114_v30, 1  ;;  %vm215_vm10 = vcmp.lt.s32.totalorder %v213_v24, %v214_v31  ;;  %v207_v46 = vrot.slane %v206_v35, 1 }
  0x44   :  { %v124_v45 = vsel %vm123_vm9, %v121_v23, %v122_v25  ;;  %v336_v47 = vrot.slane %v335_v36, 4  ;;  %vm96_vm11 = vcmp.eq.f32.partialorder %v583_v3, %v92_v38  ;;  %v180_v50 = vrot.slane %v179_v40, 4 }
  0x45   :  { %vm116_vm12 = vcmp.lt.s32.totalorder %v114_v30, %v115_v37  ;;  %v216_v52 = vsel %vm215_vm10, %v213_v24, %v214_v31  ;;  %v176_v55 = vmax.f32 %v174_v29, %v175_v39  ;;  %v125_v56 = vrot.slane %v124_v45, 1 }
  0x46   :  { %v330_v58 = vadd.f32 %v329_v43, %v328_v34  ;;  %v105_v59 = vsel %vm96_vm11, %v603_v53, 4  ;;  %vm641_vm13 = vcmp.lt.s32.totalorder %v206_v35, %v207_v46  ;;  %v337_v2 = vadd.f32 %v336_v47, %v335_v36 }
  0x47   :  { %v645_v4 = vsel %vm116_vm12, %v114_v30, %v115_v37  ;;  %v217_v5 = vrot.slane %v216_v52, 1  ;;  %v128_v6 = vsel %vm58_vm0, %v105_v59, 2147483647  ;;  %v181_v7 = vmax.f32 %v179_v40, %v180_v50 }
  0x48   :  { %v451_v44 = vpop.eup %450  ;;  %v107_v10 = vcombine.high %v105_v59, %v105_v59  ;;  %v245_v0 = vsub.f32 %v583_v3, %v92_v38  ;;  %vm126_vm14 = vcmp.lt.s32.totalorder %v124_v45, %v125_v56  ;;  %v129_v11 = vrot.slane %v128_v6, 4 }
  0x49   :  { %v252_v48 = vcombine.high %v451_v44, %v451_v44  ;;  %v256_v49 = vsel %vm58_vm0, %v451_v44, 0.0  ;;  %v177_v12 = vrot.slane %v176_v55, 1  ;;  %v182_v13 = vrot.slane %v181_v7, 2 }
  0x4a   :  { %v257_v54 = vrot.slane %v256_v49, 4  ;;  %v651_v14 = vsel %vm641_vm13, %v206_v35, %v207_v46  ;;  %v331_v17 = vrot.slane %v330_v58, 2  ;;  %vm218_vm15 = vcmp.lt.s32.totalorder %v216_v52, %v217_v5 }
  0x4b   :  { %v263_v57 = vsel %vm58_vm0, %v252_v48, 0.0  ;;  %v338_v18 = vrot.slane %v337_v2, 2  ;;  %v183_v19 = vmax.f32 %v181_v7, %v182_v13  ;;  %v248_v20 = vmul.f32 1.442695, %v245_v0 }
  0x4c   :  { %v258_v62 = vadd.f32 %v257_v54, %v256_v49  ;;  %v264_v63 = vrot.slane %v263_v57, 4  ;;  %v653_v21 = vsel %vm126_vm14, %v124_v45, %v125_v56  ;;  %v138_v3 = vsel %vm58_vm0, %v107_v10, 2147483647 }
  0x4d   :  { %vm130_vm1 = vcmp.lt.s32.totalorder %v128_v6, %v129_v11  ;;  %v178_v24 = vmax.f32 %v176_v55, %v177_v12  ;;  %v184_v25 = vrot.slane %v183_v19, 1  ;;  %452 = vpow2.f32 %v248_v20 }
  0x4e   :  { %v259_v8 = vrot.slane %v258_v62, 2  ;;  %v265_v9 = vadd.f32 %v264_v63, %v263_v57  ;;  %v656_v26 = vsel %vm218_vm15, %v216_v52, %v217_v5  ;;  %v332_v29 = vadd.f32 %v331_v17, %v330_v58 }
  0x4f   :  { %v148_v30 = vcvt.s32.f32 %v645_v4  ;;  %v240_v31 = vcvt.s32.f32 %v651_v14  ;;  %v139_v34 = vrot.slane %v138_v3, 4  ;;  %v185_v35 = vmax.f32 %v183_v19, %v184_v25 }
  0x50   :  { %v260_v15 = vadd.f32 %v259_v8, %v258_v62  ;;  %v266_v16 = vrot.slane %v265_v9, 2  ;;  %v339_v37 = vadd.f32 %v338_v18, %v337_v2  ;;  %v131_v38 = vsel %vm130_vm1, %v128_v6, %v129_v11 }
  0x51   :  { %v149_v39 = vcvt.s32.f32 %v653_v21  ;;  %v241_v40 = vcvt.s32.f32 %v656_v26  ;;  %v191_v43 = vcombine.low %v178_v24, %v185_v35  ;;  %v333_v44 = vrot.slane %v332_v29, 1 }
  0x52   :  { %v261_v22 = vrot.slane %v260_v15, 1  ;;  %v267_v23 = vadd.f32 %v266_v16, %v265_v9  ;;  %v307_v45 = vrot.slane %v637_v51, 4  ;;  %v321_v46 = vmul.f32 %v245_v0, %v608_v60 }
  0x53   :  { %v298_v47 = vadd.f32 %v297_v41, %v623_v32  ;;  %v132_v48 = vrot.slane %v131_v38, 2  ;;  %vm140_vm2 = vcmp.lt.s32.totalorder %v138_v3, %v139_v34  ;;  %vm195_vm3 = vcmp.eq.f32.partialorder %v608_v60, %v191_v43 }
  0x54   :  { %v262_v27 = vadd.f32 %v261_v22, %v260_v15  ;;  %v268_v28 = vrot.slane %v267_v23, 1  ;;  %v305_v49 = vadd.f32 %v304_v42, %v625_v33  ;;  %v340_v50 = vrot.slane %v339_v37, 1 }
  0x55   :  { %v364_v52 = vmul.f32 %v240_v31, %v148_v30  ;;  %v197_v54 = vsel %vm195_vm3, %v603_v53, 4  ;;  %v680_v32 = vmul.f32 %v241_v40, %v149_v39  ;;  %v325_v55 = vcombine.high %v321_v46, %v321_v46 }
  0x56   :  { %v269_v36 = vadd.f32 %v268_v28, %v267_v23  ;;  %454 = vlog2.f32 %v262_v27  ;;  %v199_v41 = vcombine.high %v197_v54, %v197_v54  ;;  %v220_v60 = vsel %vm58_vm0, %v197_v54, 2147483647 }
  0x57   :  { %v334_v56 = vadd.f32 %v333_v44, %v332_v29  ;;  %vm368_vm4 = vcmask 1040384   ;;  %v141_v33 = vsel %vm140_vm2, %v138_v3, %v139_v34  ;;  %v221_v42 = vrot.slane %v220_v60, 4  ;;  %v453_v58 = vpop.eup %452 }
  0x58   :  { %456 = vlog2.f32 %v269_v36  ;;  %v684_v57 = vadd.f32 %v307_v45, %v637_v51  ;;  %vm373_vm5 = vcmask 1041408   ;;  %vm686_vm6 = vcmp.lt.s32.totalorder %v131_v38, %v132_v48 }
  0x59   :  { %v230_v59 = vsel %vm58_vm0, %v199_v41, 2147483647  ;;  %v313_v61 = vsel %vm58_vm0, %v621_v1, 0.0  ;;  %v342_v62 = vsel %vm58_vm0, %v321_v46, 0.0  ;;  %vm378_vm7 = vcmask 1042432  }
  0x5a   :  { %vm222_vm8 = vcmp.lt.s32.totalorder %v220_v60, %v221_v42  ;;  %v231_v63 = vrot.slane %v230_v59, 4  ;;  %v253_v2 = vcombine.high %v453_v58, %v453_v58  ;;  %v270_v51 = vsel %vm58_vm0, %v453_v58, 0.0 }
  0x5b   :  { %v142_v5 = vrot.slane %v141_v33, 2  ;;  %v223_v6 = vsel %vm222_vm8, %v220_v60, %v221_v42  ;;  %v271_v7 = vrot.slane %v270_v51, 4  ;;  %v349_v8 = vsel %vm58_vm0, %v325_v55, 0.0 }
  0x5c   :  { %v224_v10 = vrot.slane %v223_v6, 2  ;;  %vm232_vm9 = vcmp.lt.s32.totalorder %v230_v59, %v231_v63  ;;  %v277_v0 = vsel %vm58_vm0, %v253_v2, 0.0  ;;  %v343_v11 = vrot.slane %v342_v62, 4 }
  0x5d   :  { %v233_v12 = vsel %vm232_vm9, %v230_v59, %v231_v63  ;;  %v272_v13 = vadd.f32 %v271_v7, %v270_v51  ;;  %v278_v15 = vrot.slane %v277_v0, 4  ;;  %v341_v17 = vadd.f32 %v340_v50, %v339_v37 }
  0x5e   :  { %v134_v18 = vsel %vm686_vm6, %v131_v38, %v132_v48  ;;  %vm225_vm10 = vcmp.lt.s32.totalorder %v223_v6, %v224_v10  ;;  %v314_v19 = vrot.slane %v313_v61, 4  ;;  %v234_v23 = vrot.slane %v233_v12, 2 }
  0x5f   :  { %v273_v3 = vrot.slane %v272_v13, 2  ;;  %vm699_vm11 = vcmp.lt.s32.totalorder %v141_v33, %v142_v5  ;;  %v279_v25 = vadd.f32 %v278_v15, %v277_v0  ;;  %v309_v27 = vrot.slane %v684_v57, 2 }
  0x60   :  { %v455_v9 = vpop.eup %454  ;;  %v350_v28 = vrot.slane %v349_v8, 4  ;;  %v344_v36 = vadd.f32 %v343_v11, %v342_v62  ;;  %v135_v37 = vrot.slane %v134_v18, 1  ;;  %v226_v38 = vsel %vm225_vm10, %v223_v6, %v224_v10 }
  0x61   :  { %v285_v1 = vmul.f32 0.6931472, %v455_v9  ;;  %v274_v35 = vadd.f32 %v273_v3, %v272_v13  ;;  %v280_v43 = vrot.slane %v279_v25, 2  ;;  %v315_v44 = vadd.f32 %v314_v19, %v313_v61 }
  0x62   :  { %v457_v16 = vpop.eup %456  ;;  %vm235_vm12 = vcmp.lt.s32.totalorder %v233_v12, %v234_v23  ;;  %v144_v50 = vsel %vm699_vm11, %v141_v33, %v142_v5  ;;  %v351_v54 = vadd.f32 %v350_v28, %v349_v8  ;;  %vm136_vm13 = vcmp.lt.s32.totalorder %v134_v18, %v135_v37 }
  0x63   :  { %v287_v20 = vmul.f32 0.6931472, %v457_v16  ;;  %v356_v22 = vmul.f32 %v298_v47, %v285_v1  ;;  %v275_v47 = vrot.slane %v274_v35, 1  ;;  %v316_v58 = vrot.slane %v315_v44, 2 }
  0x64   :  { %v145_v59 = vrot.slane %v144_v50, 1  ;;  %v352_v62 = vrot.slane %v351_v54, 2  ;;  %v137_v51 = vsel %vm136_vm13, %v134_v18, %v135_v37 }
  0x65   :  { %v357_v29 = vmul.f32 %v305_v49, %v287_v20  ;;  %v360_v34 = vsub.f32 %v356_v22, %v334_v56  ;;  %v281_v49 = vadd.f32 %v280_v43, %v279_v25  ;;  %v276_v55 = vadd.f32 %v275_v47, %v274_v35 }
  0x66   :  { %v227_v56 = vrot.slane %v226_v38, 1  ;;  %v317_v2 = vadd.f32 %v316_v58, %v315_v44  ;;  %vm146_vm15 = vcmp.lt.s32.totalorder %v144_v50, %v145_v59  ;;  %v353_v5 = vadd.f32 %v352_v62, %v351_v54 }
  0x67   :  { %v361_v45 = vsub.f32 %v357_v29, %v341_v17  ;;  %v369_v46 = vsel %vm368_vm4, %v360_v34, %v364_v52  ;;  %v345_v52 = vrot.slane %v344_v36, 2  ;;  %v282_v42 = vrot.slane %v281_v49, 1 }
  0x68   :  { %v374_v48 = vsel %vm373_vm5, %v369_v46, %v148_v30  ;;  %v236_v30 = vsel %vm235_vm12, %v233_v12, %v234_v23  ;;  %458 = vlog2.f32 %v276_v55  ;;  %vm228_vm14 = vcmp.lt.s32.totalorder %v226_v38, %v227_v56 }
  0x69   :  { %v370_v41 = vsel %vm368_vm4, %v361_v45, %v680_v32  ;;  %v379_v60 = vsel %vm378_vm7, %v374_v48, %v240_v31  ;;  %v310_v32 = vadd.f32 %v309_v27, %v684_v57  ;;  %v283_v31 = vadd.f32 %v282_v42, %v281_v49 }
  0x6a   :  { %v375_v4 = vsel %vm373_vm5, %v370_v41, %v149_v39  ;;  %v237_v61 = vrot.slane %v236_v30, 1  ;;  %v346_v21 = vadd.f32 %v345_v52, %v344_v36  ;;  %v229_v57 = vsel %vm228_vm14, %v226_v38, %v227_v56 }
  0x6b   :  { %v380_v33 = vsel %vm378_vm7, %v375_v4, %v241_v40  ;;  %460 = vlog2.f32 %v283_v31  ;;  %v311_v40 = vrot.slane %v310_v32, 1  ;;  %v318_v8 = vrot.slane %v317_v2, 1 }
  0x6c   :  { %v389_v14 = vcombine.low %v379_v60, %v380_v33  ;;  %v438_v53 = vcombine.low %v380_v33, %v380_v33  ;;  %vm238_vm1 = vcmp.lt.s32.totalorder %v236_v30, %v237_v61  ;;  %v347_v6 = vrot.slane %v346_v21, 1 }
  0x6d   :  { %v312_v7 = vadd.f32 %v311_v40, %v310_v32  ;;  %v147_v9 = vsel %vm146_vm15, %v144_v50, %v145_v59  ;;  %v150_v10 = vcvt.s32.f32 %v137_v51  ;;  %v239_v0 = vsel %vm238_vm1, %v236_v30, %v237_v61 }
  0x6e   :  { %v408_v39 = vsel %vm58_vm0, %v389_v14, 0.0  ;;  %v409_v63 = vsel %vm58_vm0, %v438_v53, 0.0  ;;  %v242_v11 = vcvt.s32.f32 %v229_v57  ;;  %v354_v12 = vrot.slane %v353_v5, 1 }
  0x6f   :  { %v410_v26 = vadd.f32 %v409_v63, %v408_v39  ;;  %v348_v15 = vadd.f32 %v347_v6, %v346_v21  ;;  %v151_v16 = vcvt.s32.f32 %v147_v9  ;;  %v243_v17 = vcvt.s32.f32 %v239_v0 }
  0x70   :  { %v319_v19 = vadd.f32 %v318_v8, %v317_v2  ;;  %v366_v22 = vmul.f32 %v242_v11, %v150_v10  ;;  %v355_v3 = vadd.f32 %v354_v12, %v353_v5 }
  0x71   :  { %411 = vadd.xlane.f32.xlu0 %v410_v26  ;;  %v367_v27 = vmul.f32 %v243_v17, %v151_v16 }
  0x72   :  { %v459_v1 = vpop.eup %458 }
  0x73   :  { %v289_v13 = vmul.f32 0.6931472, %v459_v1 }
  0x75   :  { %v461_v18 = vpop.eup %460  ;;  %v358_v20 = vmul.f32 %v312_v7, %v289_v13 }
  0x76   :  { %v291_v23 = vmul.f32 0.6931472, %v461_v18 }
  0x77   :  { %v362_v24 = vsub.f32 %v358_v20, %v348_v15 }
  0x78   :  { %v359_v25 = vmul.f32 %v319_v19, %v291_v23 }
  0x79   :  { %v371_v28 = vsel %vm368_vm4, %v362_v24, %v366_v22 }
  0x7a   :  { %v363_v29 = vsub.f32 %v359_v25, %v355_v3  ;;  %v376_v34 = vsel %vm373_vm5, %v371_v28, %v150_v10 }
  0x7b   :  { %v381_v36 = vsel %vm378_vm7, %v376_v34, %v242_v11 }
  0x7c   :  { %v372_v35 = vsel %vm368_vm4, %v363_v29, %v367_v27 }
  0x7d   :  { %v377_v37 = vsel %vm373_vm5, %v372_v35, %v151_v16 }
  0x7e   :  { %v382_v38 = vsel %vm378_vm7, %v377_v37, %v243_v17 }
  0x7f   :  { %v390_v43 = vcombine.low %v381_v36, %v382_v38  ;;  %v439_v44 = vcombine.low %v382_v38, %v382_v38 }
  0x81   :  { %v413_v45 = vsel %vm58_vm0, %v390_v43, 0.0  ;;  %v414_v46 = vsel %vm58_vm0, %v439_v44, 0.0 }
  0x82   :  { %v415_v47 = vadd.f32 %v414_v46, %v413_v45 }
  0x84   :  { %416 = vadd.xlane.f32.xlu0 %v415_v47 }
  0xfe   :  { %v412_v48 = vpop.xlane.xlu0 %411 }
  0xff   :  { %v418_v49 = vsel %vm58_vm0, %v412_v48, 0.0 }
 0x111   :  { %v417_v50 = vpop.xlane.xlu0 %416 }
 0x112   :  { %v419_v54 = vsel %vm58_vm0, %v417_v50, 0.0 }
 0x113   :  { %v420_v41 = vadd.f32 %v419_v54, %v418_v49 }
 0x115   :  { %421 = vst [vmem:[#allocation8] sm:$0xf] %v420_v41 }
 0x116   :  { %517 = shalt.err (!%p514_p6)
}
 0x117   :  { %s518_s10 = scalar_lea.hbm %s748_s2, 64 }
 0x118   :  { %p519_p7 = scmp.ne.s32.totalorder %s748_s2, %s518_s10  ;;  %p522_p8 = scmp.lt.u32.totalorder %s518_s10, %s748_s2 }
 0x11a   :  { %p524_p9 = pnand %p522_p8, %p519_p7 }
 0x11c   :  { %527 = shalt.err (!%p524_p9)
}
 0x11d   :  { %431 = dma.vmem_to_hbm [thread:$0]  %s429_s6, 64, %s748_s2, [#allocation5]  }
 0x11e   :  { %532 = dma.done.wait [#allocation5], 64  }
 0x11f   :  { %533 = vsyncadd [#allocation5], 4294967232 }
 0x120   :  { %435 = vsyncpa [#allocation4], 1 }
 0x121   :  { %436 = vsyncpa [#allocation7], 1 }
 0x122   :  { %437 = vsyncpa [#allocation5], 1 }

</bundles_post_ra>
